<compile_context>
chip_gen: v6e
topology: v6e:2x2x1
jax: 0.10.0
libtpu: 0.0.40
codegen_flags: <defaults>
</compile_context>

<pallas_src>
import jax
import jax.numpy as jnp
from jax.experimental import pallas as pl
from jax.experimental.pallas import tpu as pltpu


def abmil_classifier_kernel(
    x_ref,             # (Bb, N, D)  block of bags
    wab_ref, bab_ref,  # (D, 2H), (1, 2H)   fused [attention_a | attention_b]
    wc_ref, bc_ref,    # (1, H),  (1, 1)    attention_c (nH == 1, row form)
    w1_ref, b1_ref,    # (D, hidden), (1, hidden)   classifier layer 1
    w2_ref, b2_ref,    # (hidden, Cp), (1, Cp)      classifier layer 2 (lane-padded)
    out_ref,           # (Bb, Cp)   logits block (lane-padded)
):
    Bb, N, D = x_ref.shape
    H = wc_ref.shape[1]

    x3 = x_ref[...]                               # (Bb, N, D)
    x2 = x3.reshape(Bb * N, D)                    # collapse bags for one big matmul

    # Fused gated-attention projection: single MXU matmul for both branches.
    ag = (jnp.dot(x2, wab_ref[...], preferred_element_type=jnp.float32)
          + bab_ref[...]).reshape(Bb, N, 2 * H)   # (Bb, N, 2H)
    a = jnp.tanh(ag[:, :, :H])                    # attention_a branch
    g = jax.nn.sigmoid(ag[:, :, H:])              # attention_b (gate) branch
    gated = a * g                                 # (Bb, N, H); dropout == 0.0 -> no-op

    # attention_c: nH == 1, so (.,H)@(H,1) is a degenerate 1-lane MXU op.
    # Use a VPU multiply + lane reduce instead.
    scores = jnp.sum(gated * wc_ref[...], axis=-1, keepdims=True) + bc_ref[...]  # (Bb, N, 1)

    # Softmax over the instance axis, per bag.
    m = jnp.max(scores, axis=1, keepdims=True)    # (Bb, 1, 1)
    e = jnp.exp(scores - m)
    attn = e / jnp.sum(e, axis=1, keepdims=True)  # (Bb, N, 1)

    # Attention pooling without transpose / M=1 matmul:
    # broadcast multiply + sublane reduce.
    feat = jnp.sum(attn * x3, axis=1)             # (Bb, D) == per-bag slide embedding

    # Classifier MLP, batched across the bag block.
    h = jnp.maximum(
        jnp.dot(feat.astype(w1_ref.dtype), w1_ref[...],
                preferred_element_type=jnp.float32) + b1_ref[...],
        0.0,
    )                                             # (Bb, hidden)
    logits = (
        jnp.dot(h.astype(w2_ref.dtype), w2_ref[...],
                preferred_element_type=jnp.float32) + b2_ref[...]
    )                                             # (Bb, Cp)

    out_ref[...] = logits.astype(out_ref.dtype)   # single lane-dense store per step


def multiclass_classification_forward(
    x, params, *, bags_per_block=None, compute_dtype=jnp.float32
):
    """x: (B, N, D) float32 bags of instance features. Returns (B, C) logits.

    bags_per_block: bags processed per grid step. Default = all bags in one
        step (best for single-TensorCore v5e/v6e). On v7x choose e.g. B // 2
        so the 'parallel' grid axis has >= 2 steps for its 2 TensorCores.
    compute_dtype: cast x and the large weights at the call boundary
        (jnp.bfloat16 recommended on v6e/v7x); accumulation stays f32.
    """
    B, N, D = x.shape
    H = params["wa"].shape[1]
    nH = params["wc"].shape[1]
    hidden = params["w1"].shape[1]
    C = params["w2"].shape[1]
    assert nH == 1, "kernel assumes n_heads == 1 (as in the module defaults)"
    assert N % 8 == 0, "instance count must be a multiple of 8 for the in-kernel reshape"

    # Fuse attention_a / attention_b into one weight; wc as a broadcastable row.
    wab = jnp.concatenate([params["wa"], params["wb"]], axis=1).astype(compute_dtype)  # (D, 2H)
    bab = jnp.concatenate([params["ba"], params["bb"]], axis=1)                        # (1, 2H)
    wc_row = params["wc"].T                                                            # (1, H)
    bc = params["bc"]                                                                  # (1, 1)
    w1 = params["w1"].astype(compute_dtype)
    b1 = params["b1"]

    # Lane-dense logits: pad the class dim to a multiple of 128 so the output
    # store is a single unmasked vst; slice the padding off afterwards.
    Cp = ((C + 127) // 128) * 128
    w2 = params["w2"]
    b2 = params["b2"]
    if Cp != C:
        w2 = jnp.pad(w2, ((0, 0), (0, Cp - C)))
        b2 = jnp.pad(b2, ((0, 0), (0, Cp - C)))
    w2 = w2.astype(compute_dtype)

    # Bag blocking.
    Bb = B if bags_per_block is None else max(1, min(int(bags_per_block), B))
    n_blocks = pl.cdiv(B, Bb)
    B_pad = n_blocks * Bb
    x_in = x.astype(compute_dtype)
    if B_pad != B:
        x_in = jnp.pad(x_in, ((0, B_pad - B), (0, 0), (0, 0)))
    # (Bb, Cp) output block: second-to-last dim must be a multiple of 8 unless
    # it spans the whole (padded) batch.
    assert n_blocks == 1 or Bb % 8 == 0, (
        "bags_per_block must be a multiple of 8 when it does not cover the whole batch")

    full = lambda shape: pl.BlockSpec(shape, lambda b: tuple(0 for _ in shape))
    # NOTE: weight specs use constant index maps; at realistic D/hidden sizes
    # consider pipeline_mode=pl.Buffered(1) (or VMEM scratch) to avoid
    # double-buffering resident weights on v7x's 64 MiB VMEM.

    out = pl.pallas_call(
        abmil_classifier_kernel,
        out_shape=jax.ShapeDtypeStruct((B_pad, Cp), jnp.float32),
        grid_spec=pltpu.PrefetchScalarGridSpec(
            num_scalar_prefetch=0,
            grid=(n_blocks,),
            in_specs=[
                pl.BlockSpec((Bb, N, D), lambda b: (b, 0, 0)),  # x: one bag block/step
                full((D, 2 * H)), full((1, 2 * H)),             # fused wab, bab
                full((1, H)), full((1, 1)),                     # wc_row, bc
                full((D, hidden)), full((1, hidden)),           # w1, b1
                full((hidden, Cp)), full((1, Cp)),              # w2, b2 (lane-padded)
            ],
            out_specs=pl.BlockSpec((Bb, Cp), lambda b: (b, 0)),
        ),
        compiler_params=pltpu.CompilerParams(
            dimension_semantics=("parallel",),
        ),
    )(x_in, wab, bab, wc_row, bc, w1, b1, w2, b2)

    return out[:B, :C]


def reference_forward(x, params):
    """Pure-JAX reference matching the PyTorch semantics."""
    a = jnp.tanh(x @ params["wa"] + params["ba"])          # (B, N, H)
    g = jax.nn.sigmoid(x @ params["wb"] + params["bb"])    # (B, N, H)
    scores = (a * g) @ params["wc"] + params["bc"]         # (B, N, nH)
    attn = jax.nn.softmax(scores, axis=1)                  # softmax over instances
    feat = jnp.einsum("bnh,bnd->bhd", attn, x)             # (B, nH, D)
    feat = feat.reshape(x.shape[0], -1)                    # (B, nH*D) == (B, D)
    h = jnp.maximum(feat @ params["w1"] + params["b1"], 0.0)
    return h @ params["w2"] + params["b2"]


def init_params(key, input_feature_dim, head_dim, n_heads, hidden_dim, num_classes):
    """Deterministic synthetic init (uniform, roughly matching nn.Linear scale).
    Weights are stored pre-transposed as (in_dim, out_dim); biases as (1, out_dim)."""
    ks = jax.random.split(key, 10)

    def lin(kw, kb, fan_in, fan_out):
        bound = 1.0 / jnp.sqrt(fan_in)
        w = jax.random.uniform(kw, (fan_in, fan_out), jnp.float32, -bound, bound)
        b = jax.random.uniform(kb, (1, fan_out), jnp.float32, -bound, bound)
        return w, b

    wa, ba = lin(ks[0], ks[1], input_feature_dim, head_dim)
    wb, bb = lin(ks[2], ks[3], input_feature_dim, head_dim)
    wc, bc = lin(ks[4], ks[5], head_dim, n_heads)
    w1, b1 = lin(ks[6], ks[7], input_feature_dim, hidden_dim)
    w2, b2 = lin(ks[8], ks[9], hidden_dim, num_classes)
    return dict(wa=wa, ba=ba, wb=wb, bb=bb, wc=wc, bc=bc,
                w1=w1, b1=b1, w2=w2, b2=b2)


if __name__ == "__main__":
    # Small shapes consistent with the module's forward:
    #   batch of 2 slides, 8 patch features each, feature dim 32,
    #   attention head dim 16, n_heads 1, classifier hidden 16, 3 classes.
    B, N, D = 2, 8, 32
    HEAD_DIM, N_HEADS, HIDDEN, NUM_CLASSES = 16, 1, 16, 3

    key = jax.random.PRNGKey(0)
    k_x, k_p = jax.random.split(key)
    x = jax.random.normal(k_x, (B, N, D), dtype=jnp.float32)
    params = init_params(k_p, D, HEAD_DIM, N_HEADS, HIDDEN, NUM_CLASSES)

    # All bags in one grid step (best on v5e/v6e; on v7x pass bags_per_block=B//2
    # to keep both TensorCores busy once B is large enough).
    logits = multiclass_classification_forward(x, params)
    logits = jax.block_until_ready(logits)

    ref = reference_forward(x, params)
    assert logits.shape == (B, NUM_CLASSES)
    assert jnp.allclose(logits, ref, atol=1e-4, rtol=1e-4), (logits, ref)

    print("KERNEL_OK")
</pallas_src>

<mosaic_0001>
module attributes {stable_mosaic.version = 11 : i64} {
  func.func @abmil_classifier_kernel(%arg0: i32, %arg1: memref<2x8x32xf32, #tpu.memory_space<vmem>>, %arg2: memref<32x32xf32, #tpu.memory_space<vmem>>, %arg3: memref<1x32xf32, #tpu.memory_space<vmem>>, %arg4: memref<1x16xf32, #tpu.memory_space<vmem>>, %arg5: memref<1x1xf32, #tpu.memory_space<vmem>>, %arg6: memref<32x16xf32, #tpu.memory_space<vmem>>, %arg7: memref<1x16xf32, #tpu.memory_space<vmem>>, %arg8: memref<16x128xf32, #tpu.memory_space<vmem>>, %arg9: memref<1x128xf32, #tpu.memory_space<vmem>>, %arg10: memref<2x128xf32, #tpu.memory_space<vmem>>) attributes {dimension_semantics = [#tpu.dimension_semantics<parallel>], iteration_bounds = array<i64: 1>, scalar_prefetch = 0 : i64, scratch_operands = 0 : i64, tpu.core_type = #tpu.core_type<tc>, window_params = [{transform_indices = @transform_0, window_bounds = array<i64: 2, 8, 32>}, {pipeline_mode = #tpu.pipeline_mode<synchronous>, transform_indices = @transform_1, window_bounds = array<i64: 32, 32>}, {pipeline_mode = #tpu.pipeline_mode<synchronous>, transform_indices = @transform_2, window_bounds = array<i64: 1, 32>}, {pipeline_mode = #tpu.pipeline_mode<synchronous>, transform_indices = @transform_3, window_bounds = array<i64: 1, 16>}, {pipeline_mode = #tpu.pipeline_mode<synchronous>, transform_indices = @transform_4, window_bounds = array<i64: 1, 1>}, {pipeline_mode = #tpu.pipeline_mode<synchronous>, transform_indices = @transform_5, window_bounds = array<i64: 32, 16>}, {pipeline_mode = #tpu.pipeline_mode<synchronous>, transform_indices = @transform_6, window_bounds = array<i64: 1, 16>}, {pipeline_mode = #tpu.pipeline_mode<synchronous>, transform_indices = @transform_7, window_bounds = array<i64: 16, 128>}, {pipeline_mode = #tpu.pipeline_mode<synchronous>, transform_indices = @transform_8, window_bounds = array<i64: 1, 128>}, {transform_indices = @transform_9, window_bounds = array<i64: 2, 128>}]} {
    %c0 = arith.constant 0 : index
    %c0_0 = arith.constant 0 : index
    %c0_1 = arith.constant 0 : index
    %0 = vector.load %arg1[%c0, %c0_0, %c0_1] : memref<2x8x32xf32, #tpu.memory_space<vmem>>, vector<2x8x32xf32>
    %1 = vector.shape_cast %0 : vector<2x8x32xf32> to vector<16x32xf32>
    %c0_2 = arith.constant 0 : index
    %c0_3 = arith.constant 0 : index
    %2 = vector.load %arg2[%c0_2, %c0_3] : memref<32x32xf32, #tpu.memory_space<vmem>>, vector<32x32xf32>
    %cst = arith.constant dense<0.000000e+00> : vector<16x32xf32>
    %3 = tpu.matmul %1, %2, %cst {dimension_numbers = #tpu.dot_dimension_numbers<[1], [0], [0], [1], [0, 0, 1, 1], [], []>} : vector<16x32xf32>, vector<32x32xf32>, vector<16x32xf32> -> vector<16x32xf32>
    %c0_4 = arith.constant 0 : index
    %c0_5 = arith.constant 0 : index
    %4 = vector.load %arg3[%c0_4, %c0_5] : memref<1x32xf32, #tpu.memory_space<vmem>>, vector<1x32xf32>
    %5 = vector.broadcast %4 : vector<1x32xf32> to vector<16x32xf32>
    %6 = arith.addf %3, %5 : vector<16x32xf32>
    %7 = vector.shape_cast %6 : vector<16x32xf32> to vector<2x8x32xf32>
    %8 = vector.extract_strided_slice %7 {offsets = [0, 0, 0], sizes = [2, 8, 16], strides = [1, 1, 1]} : vector<2x8x32xf32> to vector<2x8x16xf32>
    %9 = math.tanh %8 : vector<2x8x16xf32>
    %10 = vector.extract_strided_slice %7 {offsets = [0, 0, 16], sizes = [2, 8, 16], strides = [1, 1, 1]} : vector<2x8x32xf32> to vector<2x8x16xf32>
    %11 = arith.negf %10 : vector<2x8x16xf32>
    %12 = math.exp %11 : vector<2x8x16xf32>
    %cst_6 = arith.constant 1.000000e+00 : f32
    %13 = vector.broadcast %cst_6 : f32 to vector<2x8x16xf32>
    %14 = arith.addf %13, %12 : vector<2x8x16xf32>
    %15 = arith.divf %13, %14 : vector<2x8x16xf32>
    %16 = arith.mulf %9, %15 : vector<2x8x16xf32>
    %c0_7 = arith.constant 0 : index
    %c0_8 = arith.constant 0 : index
    %17 = vector.load %arg4[%c0_7, %c0_8] : memref<1x16xf32, #tpu.memory_space<vmem>>, vector<1x16xf32>
    %18 = vector.shape_cast %17 : vector<1x16xf32> to vector<1x1x16xf32>
    %19 = vector.broadcast %18 : vector<1x1x16xf32> to vector<2x8x16xf32>
    %20 = arith.mulf %16, %19 : vector<2x8x16xf32>
    %cst_9 = arith.constant dense<0.000000e+00> : vector<2x8xf32>
    %21 = vector.multi_reduction <add>, %20, %cst_9 [2] : vector<2x8x16xf32> to vector<2x8xf32>
    %22 = vector.shape_cast %21 : vector<2x8xf32> to vector<2x8x1xf32>
    %c0_10 = arith.constant 0 : index
    %c0_11 = arith.constant 0 : index
    %23 = vector.load %arg5[%c0_10, %c0_11] : memref<1x1xf32, #tpu.memory_space<vmem>>, vector<1x1xf32>
    %24 = vector.shape_cast %23 : vector<1x1xf32> to vector<1x1x1xf32>
    %25 = vector.broadcast %24 : vector<1x1x1xf32> to vector<2x8x1xf32>
    %26 = arith.addf %22, %25 : vector<2x8x1xf32>
    %cst_12 = arith.constant dense<0xFF800000> : vector<2x1xf32>
    %27 = vector.multi_reduction <maximumf>, %26, %cst_12 [1] : vector<2x8x1xf32> to vector<2x1xf32>
    %28 = vector.shape_cast %27 : vector<2x1xf32> to vector<2x1x1xf32>
    %29 = vector.broadcast %28 : vector<2x1x1xf32> to vector<2x8x1xf32>
    %30 = arith.subf %26, %29 : vector<2x8x1xf32>
    %31 = math.exp %30 : vector<2x8x1xf32>
    %cst_13 = arith.constant dense<0.000000e+00> : vector<2x1xf32>
    %32 = vector.multi_reduction <add>, %31, %cst_13 [1] : vector<2x8x1xf32> to vector<2x1xf32>
    %33 = vector.shape_cast %32 : vector<2x1xf32> to vector<2x1x1xf32>
    %34 = vector.broadcast %33 : vector<2x1x1xf32> to vector<2x8x1xf32>
    %35 = arith.divf %31, %34 : vector<2x8x1xf32>
    %36 = vector.broadcast %35 : vector<2x8x1xf32> to vector<2x8x32xf32>
    %37 = arith.mulf %36, %0 : vector<2x8x32xf32>
    %cst_14 = arith.constant dense<0.000000e+00> : vector<2x32xf32>
    %38 = vector.multi_reduction <add>, %37, %cst_14 [1] : vector<2x8x32xf32> to vector<2x32xf32>
    %c0_15 = arith.constant 0 : index
    %c0_16 = arith.constant 0 : index
    %39 = vector.load %arg6[%c0_15, %c0_16] : memref<32x16xf32, #tpu.memory_space<vmem>>, vector<32x16xf32>
    %cst_17 = arith.constant dense<0.000000e+00> : vector<2x16xf32>
    %40 = tpu.matmul %38, %39, %cst_17 {dimension_numbers = #tpu.dot_dimension_numbers<[1], [0], [0], [1], [0, 0, 1, 1], [], []>} : vector<2x32xf32>, vector<32x16xf32>, vector<2x16xf32> -> vector<2x16xf32>
    %c0_18 = arith.constant 0 : index
    %c0_19 = arith.constant 0 : index
    %41 = vector.load %arg7[%c0_18, %c0_19] : memref<1x16xf32, #tpu.memory_space<vmem>>, vector<1x16xf32>
    %42 = vector.broadcast %41 : vector<1x16xf32> to vector<2x16xf32>
    %43 = arith.addf %40, %42 : vector<2x16xf32>
    %cst_20 = arith.constant 0.000000e+00 : f32
    %44 = vector.broadcast %cst_20 : f32 to vector<2x16xf32>
    %45 = arith.maximumf %43, %44 : vector<2x16xf32>
    %c0_21 = arith.constant 0 : index
    %c0_22 = arith.constant 0 : index
    %46 = vector.load %arg8[%c0_21, %c0_22] : memref<16x128xf32, #tpu.memory_space<vmem>>, vector<16x128xf32>
    %cst_23 = arith.constant dense<0.000000e+00> : vector<2x128xf32>
    %47 = tpu.matmul %45, %46, %cst_23 {dimension_numbers = #tpu.dot_dimension_numbers<[1], [0], [0], [1], [0, 0, 1, 1], [], []>} : vector<2x16xf32>, vector<16x128xf32>, vector<2x128xf32> -> vector<2x128xf32>
    %c0_24 = arith.constant 0 : index
    %c0_25 = arith.constant 0 : index
    %48 = vector.load %arg9[%c0_24, %c0_25] : memref<1x128xf32, #tpu.memory_space<vmem>>, vector<1x128xf32>
    %49 = vector.broadcast %48 : vector<1x128xf32> to vector<2x128xf32>
    %50 = arith.addf %47, %49 : vector<2x128xf32>
    %c0_26 = arith.constant 0 : index
    %c0_27 = arith.constant 0 : index
    %51 = vector.load %arg10[%c0_26, %c0_27] : memref<2x128xf32, #tpu.memory_space<vmem>>, vector<2x128xf32>
    tpu.vector_store %arg10[%c0_26, %c0_27], %50 {strides = array<i32>} : memref<2x128xf32, #tpu.memory_space<vmem>>, vector<2x128xf32>,
    return
  }
  func.func @transform_0(%arg0: i32) -> (i32, i32, i32) {
    %c0_i32 = arith.constant 0 : i32
    %c0_i32_0 = arith.constant 0 : i32
    %c0_i32_1 = arith.constant 0 : i32
    return %arg0, %c0_i32, %c0_i32_0 : i32, i32, i32
  }
  func.func @transform_1(%arg0: i32) -> (i32, i32) {
    %c0_i32 = arith.constant 0 : i32
    %c0_i32_0 = arith.constant 0 : i32
    %c0_i32_1 = arith.constant 0 : i32
    return %c0_i32, %c0_i32_0 : i32, i32
  }
  func.func @transform_2(%arg0: i32) -> (i32, i32) {
    %c0_i32 = arith.constant 0 : i32
    %c0_i32_0 = arith.constant 0 : i32
    %c0_i32_1 = arith.constant 0 : i32
    return %c0_i32, %c0_i32_0 : i32, i32
  }
  func.func @transform_3(%arg0: i32) -> (i32, i32) {
    %c0_i32 = arith.constant 0 : i32
    %c0_i32_0 = arith.constant 0 : i32
    %c0_i32_1 = arith.constant 0 : i32
    return %c0_i32, %c0_i32_0 : i32, i32
  }
  func.func @transform_4(%arg0: i32) -> (i32, i32) {
    %c0_i32 = arith.constant 0 : i32
    %c0_i32_0 = arith.constant 0 : i32
    %c0_i32_1 = arith.constant 0 : i32
    return %c0_i32, %c0_i32_0 : i32, i32
  }
  func.func @transform_5(%arg0: i32) -> (i32, i32) {
    %c0_i32 = arith.constant 0 : i32
    %c0_i32_0 = arith.constant 0 : i32
    %c0_i32_1 = arith.constant 0 : i32
    return %c0_i32, %c0_i32_0 : i32, i32
  }
  func.func @transform_6(%arg0: i32) -> (i32, i32) {
    %c0_i32 = arith.constant 0 : i32
    %c0_i32_0 = arith.constant 0 : i32
    %c0_i32_1 = arith.constant 0 : i32
    return %c0_i32, %c0_i32_0 : i32, i32
  }
  func.func @transform_7(%arg0: i32) -> (i32, i32) {
    %c0_i32 = arith.constant 0 : i32
    %c0_i32_0 = arith.constant 0 : i32
    %c0_i32_1 = arith.constant 0 : i32
    return %c0_i32, %c0_i32_0 : i32, i32
  }
  func.func @transform_8(%arg0: i32) -> (i32, i32) {
    %c0_i32 = arith.constant 0 : i32
    %c0_i32_0 = arith.constant 0 : i32
    %c0_i32_1 = arith.constant 0 : i32
    return %c0_i32, %c0_i32_0 : i32, i32
  }
  func.func @transform_9(%arg0: i32) -> (i32, i32) {
    %c0_i32 = arith.constant 0 : i32
    %c0_i32_0 = arith.constant 0 : i32
    return %arg0, %c0_i32 : i32, i32
  }
}

</mosaic_0001>

<bundles_post_ra>
// kernel: tpu_custom_call.1
= control target key start
LH: loop header
LB: loop body
LE: loop exit
PB: predicated region body
PF: predicated region fallthrough
CT: control target
= control target key end

     0   :  { %s701_s0 = inlined_call_operand.vmem [shape: f32[2,8,32], index: 0, kind: input, shape index: {}]   ;;  %s702_s1 = inlined_call_operand.vmem [shape: f32[32,32], index: 1, kind: input, shape index: {}]   ;;  %s703_s2 = inlined_call_operand.vmem [shape: f32[1,32], index: 2, kind: input, shape index: {}]   ;;  %s704_s3 = inlined_call_operand.vmem [shape: f32[1,16], index: 3, kind: input, shape index: {}]   ;;  %s705_s4 = inlined_call_operand.<no memory space> [shape: f32[1,1], index: 4, kind: input, shape index: {}]   ;;  %s706_s5 = inlined_call_operand.vmem [shape: f32[32,16], index: 5, kind: input, shape index: {}]   ;;  %s707_s6 = inlined_call_operand.vmem [shape: f32[1,16], index: 6, kind: input, shape index: {}]   ;;  %s708_s7 = inlined_call_operand.hbm [shape: f32[16,128], index: 7, kind: input, shape index: {}]   ;;  %s709_s8 = inlined_call_operand.vmem [shape: f32[1,128], index: 8, kind: input, shape index: {}]   ;;  %s710_s9 = inlined_call_operand.hbm [shape: f32[2,128], index: 9, kind: output, shape index: {}]  }
   0x1   :  { %v14_v0 = vstv %s705_s4 }
   0x2   :  { %15 = vst [vmem:[#allocation2] sm:$0x1] %v14_v0 }
   0x3   :  { %16 = vsyncpa [#allocation4], 0 }
   0x4   :  { %17 = vsyncpa [#allocation5], 0  ;;  %s572_s11 = smov [#allocation3]  }
   0x5   :  { %s37_s12 = sshll.u32 %s572_s11, 4  ;;  %s38_s12 = int_to_ptr.vmem [resolvable:$true] %s37_s12 }
   0x6   :  { %s536_s13 = scalar_lea.vmem %s38_s12, 256  ;;  %p541_p1 = scmp.lt.s32.totalorder %s38_s12, %s38_s12 }
   0x7   :  { %p537_p0 = scmp.ne.s32.totalorder %s38_s12, %s536_s13  ;;  %p542_p2 = scmp.lt.s32.totalorder %s536_s13, %s536_s13 }
   0x9   :  { %p543_p3 = por %p542_p2, %p541_p1 }
   0xb   :  { %p544_p4 = pnand %p543_p3, %p537_p0 }
   0xd   :  { %547 = shalt.err (!%p544_p4)
}
   0xe   :  { %s573_s14 = smov 128   ;;  %s574_s15 = smov 8  }
   0xf   :  { %43 = dma.hbm_to_vmem [thread:$0]  %s708_s7, 256, %s38_s12, [#allocation4], %s573_s14, %s573_s14, %s574_s15  }
  0x10   :  { %568 = dma.done.wait [#allocation4], 256  }
  0x11   :  { %569 = vsyncadd [#allocation4], 4294967040  ;;  %vm62_vm0 = vcmask 261120   ;;  %v54_v1 = vld [vmem:[%s702_s1 + $0x18] sm:$0xff]  ;;  %v53_v2 = vld [vmem:[%s702_s1 + $0x10] sm:$0xff]  ;;  %vm177_vm1 = vcmask 130048  }
  0x12   :  { %469 = vmatprep.subr.mxu0 %v54_v1  ;;  %v645_v3 = vld [vmem:[%s701_s0] sm:$0xff]  ;;  %v52_v4 = vld [vmem:[%s702_s1 + $0x8] sm:$0xff]  ;;  %v576_v31 = vmov 0   ;;  %vm193_vm2 = vcmask 7168   ;;  %vm578_vm3 = vmmov 0   ;;  %vm271_vm4 = vcmask 1041409  }
  0x13   :  { %470 = vmatpush3.msra.mxu0 %v54_v1  ;;  %477 = vmatprep.mubr.msk.f32.mxu0 %vm62_vm0, %v645_v3  ;;  %v51_v5 = vld [vmem:[%s702_s1] sm:$0xff]  ;;  %v658_v6 = vld [vmem:[%s701_s0 + $0x8] sm:$0xff]  ;;  %s575_s0 = smov 112   ;;  %s579_s18 = smov [#allocation6]  }
  0x14   :  { %471 = vmatprep.subr.mxu0 %v53_v2  ;;  %v444_v7 = vld [vmem:[%s703_s2] ss:$0 sm:$0xff]  ;;  %506 = vset.pattern.permute.xlu0 %v576_v31  ;;  %s435_s19 = sshll.u32 %s579_s18, 4  ;;  %s436_s19 = int_to_ptr.vmem [resolvable:$true] %s435_s19 }
  0x15   :  { %472 = vmatpush3.msra.mxu0 %v53_v2  ;;  %v449_v22 = vld [vmem:[%s704_s3] ss:$0 sm:$0xff]  ;;  %507 = vset.pattern.permute.xlu1 %v576_v31  ;;  %s548_s20 = scalar_lea.vmem %s436_s19, 32  ;;  %p553_p6 = scmp.lt.s32.totalorder %s436_s19, %s436_s19 }
  0x16   :  { %473 = vmatprep.subr.mxu0 %v52_v4  ;;  %v450_v32 = vld [vmem:[#allocation2] ss:$0 sm:$0xff]  ;;  %p549_p5 = scmp.ne.s32.totalorder %s436_s19, %s548_s20  ;;  %p554_p7 = scmp.lt.s32.totalorder %s548_s20, %s548_s20 }
  0x17   :  { %474 = vmatpush3.msra.mxu0 %v52_v4 }
  0x18   :  { %475 = vmatprep.subr.mxu0 %v51_v5  ;;  %p555_p8 = por %p554_p7, %p553_p6 }
  0x19   :  { %476 = vmatpush3.msra.mxu0 %v51_v5 }
  0x1a   :  { %478 = vmatmul.mubr.msk.f32.vlgmr.msra.gmra.mxu0 %vm62_vm0, %v658_v6  ;;  %p556_p9 = pnand %p555_p8, %p549_p5 }
  0xda   :  { %v479_v8 = vpop.f32.mrf.mxu0 }
  0xdb   :  { %v141_v9 = vadd.f32 %v479_v8, %v444_v7 }
  0xdc   :  { %v135_v10 = vpop.f32.mrf.mxu0 }
  0xdd   :  { %v448_v11 = vmul.f32 -1.442695, %v141_v9  ;;  %v136_v12 = vadd.f32 %v444_v7, %v135_v10 }
  0xdf   :  { %v447_v13 = vmul.f32 -1.442695, %v136_v12  ;;  %508 = vpow2.f32 %v448_v11 }
  0xe1   :  { %510 = vpow2.f32 %v447_v13  ;;  %v577_v13 = vmov 0.0  }
  0xe2   :  { %480 = vmatprep.subr.mxu1 %v577_v13  ;;  %491 = vmatprep.subr.mxu0 %v577_v13 }
  0xe3   :  { %488 = vmatprep.mubr.msk.f32.mxu1 %vm578_vm3, %v577_v13  ;;  %495 = vmatprep.mubr.msk.f32.mxu0 %vm578_vm3, %v577_v13 }
  0xec   :  { %v509_v14 = vpop.eup %508 }
  0xed   :  { %v153_v17 = vadd.f32 1.0, %v509_v14  ;;  %v261_v14 = vld [vmem:[%s706_s5 + $0x18] sm:$0xff] }
  0xee   :  { %v511_v15 = vpop.eup %510  ;;  %481 = vmatpush3.msra.mxu1 %v261_v14 }
  0xef   :  { %v152_v16 = vadd.f32 1.0, %v511_v15  ;;  %482 = vmatprep.subr.mxu1 %v577_v13  ;;  %v260_v15 = vld [vmem:[%s706_s5 + $0x10] sm:$0xff] }
  0xf0   :  { %483 = vmatpush3.msra.mxu1 %v260_v15 }
  0xf1   :  { %512 = vrcp.f32 %v152_v16  ;;  %484 = vmatprep.subr.mxu1 %v577_v13  ;;  %v259_v16 = vld [vmem:[%s706_s5 + $0x8] sm:$0xff] }
  0xf2   :  { %514 = vrcp.f32 %v153_v17  ;;  %v258_v17 = vld [vmem:[%s706_s5] sm:$0xff]  ;;  %485 = vmatpush3.msra.mxu1 %v259_v16 }
  0xf3   :  { %516 = vtanh.f32 %v136_v12  ;;  %486 = vmatprep.subr.mxu1 %v577_v13 }
  0xf4   :  { %518 = vtanh.f32 %v141_v9  ;;  %487 = vmatpush3.msra.mxu1 %v258_v17 }
  0xfe   :  { %v513_v18 = vpop.eup %512 }
  0xff   :  { %160 = vrot.lane.b32.xlu0 %v513_v18, %s575_s0  ;;  %v515_v19 = vpop.eup %514 }
 0x100   :  { %v517_v20 = vpop.eup %516 }
 0x101   :  { %v519_v25 = vpop.eup %518 }
 0x103   :  { %162 = vrot.lane.b32.xlu0 %v515_v19, %s575_s0 }
 0x171   :  { %v161_v21 = vpop.permute.xlu0 %160 }
 0x172   :  { %v166_v23 = vmul.f32 %v517_v20, %v161_v21 }
 0x174   :  { %v175_v24 = vmul.f32 %v449_v22, %v166_v23 }
 0x175   :  { %v163_v26 = vpop.permute.xlu0 %162 }
 0x176   :  { %v167_v27 = vmul.f32 %v519_v25, %v163_v26  ;;  %v178_v28 = vsel %vm177_vm1, %v175_v24, 0.0 }
 0x177   :  { %179 = vadd.xlane.f32.xlu1 %v178_v28 }
 0x178   :  { %v176_v29 = vmul.f32 %v449_v22, %v167_v27 }
 0x17a   :  { %v181_v30 = vsel %vm177_vm1, %v176_v29, 0.0 }
 0x17b   :  { %182 = vadd.xlane.f32.xlu1 %v181_v30 }
 0x200   :  { %v180_v33 = vpop.xlane.xlu1 %179 }
 0x201   :  { %v191_v34 = vadd.f32 %v450_v32, %v180_v33 }
 0x203   :  { %v194_v35 = vsel %vm193_vm2, %v191_v34, -inf }
 0x204   :  { %v195_v36 = vrot.slane %v194_v35, 4  ;;  %v183_v37 = vpop.xlane.xlu1 %182 }
 0x205   :  { %v192_v38 = vadd.f32 %v450_v32, %v183_v37  ;;  %v451_v37 = vld [vmem:[%s707_s6] ss:$0 sm:$0xff] }
 0x206   :  { %v196_v39 = vmax.f32 %v194_v35, %v195_v36  ;;  %v347_v36 = vld [vmem:[#allocation3 + $0x8] sm:$0xff] }
 0x207   :  { %v201_v40 = vsel %vm193_vm2, %v192_v38, -inf  ;;  %492 = vmatpush3.msra.mxu0 %v347_v36 }
 0x208   :  { %v197_v41 = vrot.slane %v196_v39, 2  ;;  %v202_v42 = vrot.slane %v201_v40, 4  ;;  %493 = vmatprep.subr.mxu0 %v577_v13 }
 0x20a   :  { %v198_v43 = vmax.f32 %v196_v39, %v197_v41  ;;  %v203_v44 = vmax.f32 %v201_v40, %v202_v42  ;;  %v453_v42 = vld [vmem:[%s709_s8] ss:$0 sm:$0xff] }
 0x20c   :  { %v199_v45 = vrot.slane %v198_v43, 1  ;;  %v204_v46 = vrot.slane %v203_v44, 2 }
 0x20e   :  { %v200_v47 = vmax.f32 %v198_v43, %v199_v45  ;;  %v205_v48 = vmax.f32 %v203_v44, %v204_v46 }
 0x210   :  { %v208_v49 = vsub.f32 %v191_v34, %v200_v47  ;;  %v206_v50 = vrot.slane %v205_v48, 1 }
 0x212   :  { %v210_v51 = vmul.f32 1.442695, %v208_v49  ;;  %v207_v52 = vmax.f32 %v205_v48, %v206_v50 }
 0x214   :  { %520 = vpow2.f32 %v210_v51  ;;  %v209_v53 = vsub.f32 %v192_v38, %v207_v52 }
 0x216   :  { %v212_v54 = vmul.f32 1.442695, %v209_v53 }
 0x218   :  { %522 = vpow2.f32 %v212_v54 }
 0x221   :  { %v521_v55 = vpop.eup %520 }
 0x222   :  { %v214_v56 = vsel %vm193_vm2, %v521_v55, 0.0 }
 0x223   :  { %v215_v57 = vrot.slane %v214_v56, 4 }
 0x225   :  { %v523_v58 = vpop.eup %522  ;;  %v216_v59 = vadd.f32 %v215_v57, %v214_v56 }
 0x226   :  { %v221_v60 = vsel %vm193_vm2, %v523_v58, 0.0 }
 0x227   :  { %v217_v61 = vrot.slane %v216_v59, 2  ;;  %v222_v62 = vrot.slane %v221_v60, 4 }
 0x229   :  { %v218_v63 = vadd.f32 %v217_v61, %v216_v59  ;;  %v223_v0 = vadd.f32 %v222_v62, %v221_v60 }
 0x22b   :  { %v219_v1 = vrot.slane %v218_v63, 1  ;;  %v224_v2 = vrot.slane %v223_v0, 2 }
 0x22d   :  { %v220_v4 = vadd.f32 %v219_v1, %v218_v63  ;;  %v225_v5 = vadd.f32 %v224_v2, %v223_v0 }
 0x22f   :  { %524 = vrcp.f32 %v220_v4  ;;  %v226_v7 = vrot.slane %v225_v5, 1 }
 0x231   :  { %v227_v8 = vadd.f32 %v226_v7, %v225_v5 }
 0x233   :  { %526 = vrcp.f32 %v227_v8 }
 0x23c   :  { %v525_v9 = vpop.eup %524 }
 0x23d   :  { %v229_v10 = vmul.f32 %v525_v9, %v521_v55 }
 0x23f   :  { %234 = vperm.xlu0 %506, %v229_v10  }
 0x240   :  { %v527_v11 = vpop.eup %526 }
 0x241   :  { %v231_v12 = vmul.f32 %v527_v11, %v523_v58 }
 0x243   :  { %239 = vperm.xlu1 %507, %v231_v12  }
 0x2ba   :  { %v235_v18 = vpop.permute.xlu0 %234 }
 0x2bb   :  { %v242_v19 = vmul.f32 %v235_v18, %v645_v3 }
 0x2bd   :  { %v244_v20 = vsel %vm62_vm0, %v242_v19, 0.0 }
 0x2be   :  { %v245_v21 = vrot.slane %v244_v20, 4  ;;  %v240_v22 = vpop.permute.xlu1 %239 }
 0x2bf   :  { %v243_v23 = vmul.f32 %v240_v22, %v658_v6  ;;  %v346_v6 = vld [vmem:[#allocation3] sm:$0xff] }
 0x2c0   :  { %v246_v24 = vadd.f32 %v245_v21, %v244_v20  ;;  %494 = vmatpush3.msra.mxu0 %v346_v6 }
 0x2c1   :  { %v251_v25 = vsel %vm62_vm0, %v243_v23, 0.0 }
 0x2c2   :  { %v247_v26 = vrot.slane %v246_v24, 2  ;;  %v252_v27 = vrot.slane %v251_v25, 4 }
 0x2c4   :  { %v248_v28 = vadd.f32 %v247_v26, %v246_v24  ;;  %v253_v29 = vadd.f32 %v252_v27, %v251_v25 }
 0x2c6   :  { %v254_v30 = vrot.slane %v253_v29, 2  ;;  %v249_v31 = vrot.slane %v248_v28, 1 }
 0x2c8   :  { %v255_v32 = vadd.f32 %v254_v30, %v253_v29  ;;  %v250_v34 = vadd.f32 %v249_v31, %v248_v28 }
 0x2ca   :  { %v256_v33 = vrot.slane %v255_v32, 1 }
 0x2cc   :  { %v257_v3 = vadd.f32 %v256_v33, %v255_v32 }
 0x2ce   :  { %v272_v35 = vsel %vm271_vm4, %v257_v3, %v250_v34 }
 0x2cf   :  { %489 = vmatmul.mubr.msk.f32.vlgmr.msra.gmra.mxu1 %vm62_vm0, %v272_v35 }
 0x38f   :  { %v341_v38 = vpop.f32.mrf.mxu1 }
 0x390   :  { %v342_v39 = vadd.f32 %v451_v37, %v341_v38 }
 0x391   :  { %v490_v40 = vpop.f32.mrf.mxu1 }
 0x392   :  { %v345_v41 = vmax.f32 %v342_v39, 0.0 }
 0x394   :  { %496 = vmatmul.mubr.msk.f32.vlgmr.msra.gmra.mxu0 %vm177_vm1, %v345_v41 }
 0x454   :  { %v424_v43 = vpop.f32.mrf.mxu0 }
 0x455   :  { %v425_v44 = vadd.f32 %v453_v42, %v424_v43 }
 0x456   :  { %v497_v45 = vpop.f32.mrf.mxu0 }
 0x457   :  { %428 = vst [vmem:[#allocation6] sm:$0x3] %v425_v44 }
 0x458   :  { %559 = shalt.err (!%p556_p9)
}
 0x459   :  { %438 = dma.vmem_to_hbm [thread:$0]  %s436_s19, 32, %s710_s9, [#allocation5]  }
 0x45a   :  { %570 = dma.done.wait [#allocation5], 32  }
 0x45b   :  { %571 = vsyncadd [#allocation5], 4294967264 }
 0x45c   :  { %442 = vsyncpa [#allocation4], 1 }
 0x45d   :  { %443 = vsyncpa [#allocation5], 1 }

</bundles_post_ra>
